<compile_context>
chip_gen: v5e
topology: v5e:2x2
jax: 0.10.0
libtpu: 0.0.40
codegen_flags: <defaults>
</compile_context>

<pallas_src>
import functools

import jax
import jax.numpy as jnp
from jax import lax
from jax.experimental import pallas as pl
from jax.experimental.pallas import tpu as pltpu


# --------------------------------------------------------------------------- #
# Pass 1: merged = s0 * w0 + m_in * w1 + m_out * w2        (tiled over vocab)
# --------------------------------------------------------------------------- #
def _merge_kernel(w0_ref, w1_ref, w2_ref, m_in_ref, m_out_ref, s0_ref, o_ref):
    s0 = s0_ref[0]                                   # scalar mask (SMEM)
    w0 = w0_ref[...].astype(jnp.float32)
    w1 = w1_ref[...].astype(jnp.float32)
    w2 = w2_ref[...].astype(jnp.float32)
    m_in = m_in_ref[...].astype(jnp.float32)         # (1, H)  vector_input mask
    m_out = m_out_ref[...].astype(jnp.float32)       # (TV, 1) vector_output mask
    merged = w0 * s0 + w1 * m_in + w2 * m_out        # f32 accumulate, cast at store
    o_ref[...] = merged.astype(o_ref.dtype)


def _pick_vocab_tile(v, h, itemsize, budget_bytes=8 << 20):
    # 3 weight inputs + 1 output, each double-buffered by the BlockSpec pipeline.
    # Conservative budget fits every generation's default scoped VMEM limit.
    per_row = (3 + 1) * 2 * h * itemsize + 2 * itemsize
    tv = budget_bytes // max(per_row, 1)
    if tv >= v:
        return v                                     # full-extent block (always legal)
    return int(min(max(8, (tv // 8) * 8), 4096))


def _merge_tables(w0, w1, w2, scalar_mask, vec_in_mask, vec_out_mask):
    V, H = w0.shape
    dtype = w0.dtype
    tv = _pick_vocab_tile(V, H, jnp.dtype(dtype).itemsize)
    nv = pl.cdiv(V, tv)

    m_in = jnp.asarray(vec_in_mask, jnp.float32).reshape(1, H)
    m_out = jnp.asarray(vec_out_mask, jnp.float32).reshape(V, 1)   # VMEM, not SMEM (scales with V)
    s0 = jnp.asarray(scalar_mask, jnp.float32).reshape(1)

    grid_spec = pltpu.PrefetchScalarGridSpec(
        num_scalar_prefetch=0,
        grid=(nv,),
        in_specs=[
            pl.BlockSpec((tv, H), lambda i: (i, 0)),              # w0
            pl.BlockSpec((tv, H), lambda i: (i, 0)),              # w1
            pl.BlockSpec((tv, H), lambda i: (i, 0)),              # w2
            pl.BlockSpec((1, H), lambda i: (0, 0)),               # vector_input mask
            pl.BlockSpec((tv, 1), lambda i: (i, 0)),              # vector_output mask
            pl.BlockSpec(memory_space=pltpu.MemorySpace.SMEM),    # scalar mask
        ],
        out_specs=pl.BlockSpec((tv, H), lambda i: (i, 0)),
    )
    return pl.pallas_call(
        _merge_kernel,
        out_shape=jax.ShapeDtypeStruct((V, H), dtype),
        grid_spec=grid_spec,
        compiler_params=pltpu.CompilerParams(
            dimension_semantics=("parallel",)),       # independent vocab tiles (2 TCs on v7x)
    )(w0, w1, w2, m_in, m_out, s0)


# --------------------------------------------------------------------------- #
# Pass 2: out[t] = merged[ids[t]]   (batched, double-buffered manual row gather)
# --------------------------------------------------------------------------- #
def _gather_kernel(tb, ids_ref, merged_hbm, o_ref, buf, sems):
    step = pl.program_id(0)
    nsteps = pl.num_programs(0)

    def issue(block_idx, slot):
        base = block_idx * tb
        for t in range(tb):                           # tb is small & static -> unrolled
            row = ids_ref[base + t]
            pltpu.make_async_copy(
                merged_hbm.at[pl.ds(row, 1)],         # one (1, H) row from HBM
                buf.at[slot, pl.ds(t, 1)],
                sems.at[slot],                        # all tb copies signal this slot's sem
            ).start()

    # Prime the pipeline on the first grid step.
    @pl.when(step == 0)
    def _():
        issue(0, 0)

    slot = lax.rem(step, 2)

    # Wait for the current block's tb row copies (each wait consumes one row's bytes).
    for t in range(tb):
        pltpu.make_async_copy(
            merged_hbm.at[pl.ds(0, 1)],
            buf.at[slot, pl.ds(t, 1)],
            sems.at[slot],
        ).wait()

    # Prefetch the next token block into the other slot; it overlaps this block's
    # vector store and output writeback.
    @pl.when(step + 1 < nsteps)
    def _():
        issue(step + 1, 1 - slot)

    o_ref[...] = buf[slot]                            # one (tb, H) 8-sublane store


def _gather_rows(merged, ids_flat, tb):
    V, H = merged.shape
    T = ids_flat.shape[0]
    t_pad = pl.cdiv(T, tb) * tb
    if t_pad != T:
        ids_flat = jnp.pad(ids_flat, (0, t_pad - T))  # padded slots gather row 0, sliced off
    nsteps = t_pad // tb

    # TODO(synk): for very long sequences the (T,) ids scalar-prefetch array should be
    # chunked (SMEM 1-D padding grows as next_pow2(4T)).
    grid_spec = pltpu.PrefetchScalarGridSpec(
        num_scalar_prefetch=1,                        # ids -> SMEM
        grid=(nsteps,),
        in_specs=[pl.BlockSpec(memory_space=pl.ANY)], # merged table stays in HBM
        out_specs=pl.BlockSpec((tb, H), lambda s, ids: (s, 0)),
        scratch_shapes=[
            pltpu.VMEM((2, tb, H), merged.dtype),     # double-buffered gathered rows
            pltpu.SemaphoreType.DMA((2,)),            # one DMA semaphore per slot
        ],
    )
    out = pl.pallas_call(
        functools.partial(_gather_kernel, tb),
        out_shape=jax.ShapeDtypeStruct((t_pad, H), merged.dtype),
        grid_spec=grid_spec,
        # The cross-step double buffer makes grid iterations dependent, so this axis
        # must stay "arbitrary" (not megacore-parallel).
        compiler_params=pltpu.CompilerParams(
            dimension_semantics=("arbitrary",)),
    )(ids_flat, merged)
    return out[:T]


def embeddings_with_masks(input_ids, w0, w1, w2, scalar_mask, vec_in_mask, vec_out_mask):
    """input_ids: (B, S) int32; w*: (V, H); masks: scalar (), (H,), (V, 1)."""
    B, S = input_ids.shape
    V, H = w0.shape

    merged = _merge_tables(w0, w1, w2, scalar_mask, vec_in_mask, vec_out_mask)

    ids = input_ids.reshape(B * S).astype(jnp.int32)
    # 8 tokens/step for 4-byte dtypes, 16 for 2-byte (sublane packing).
    tb = 8 if jnp.dtype(w0.dtype).itemsize >= 4 else 16
    out = _gather_rows(merged, ids, tb)

    # TODO(synk): max_norm renormalization not implemented (module default max_norm=None);
    # padding_idx only affects gradients, so it is a no-op in forward.
    return out.reshape(B, S, H)


if __name__ == "__main__":
    # Small deterministic setup: 3 embeddings sharing (V, H), one mask each:
    # modes = ['scalar', 'vector_input', 'vector_output']
    B, S = 2, 8
    V, H = 64, 32

    key = jax.random.PRNGKey(0)
    k0, k1, k2, k3, k4, k5 = jax.random.split(key, 6)

    w0 = jax.random.normal(k0, (V, H), dtype=jnp.float32)
    w1 = jax.random.normal(k1, (V, H), dtype=jnp.float32)
    w2 = jax.random.normal(k2, (V, H), dtype=jnp.float32)

    scalar_mask = jnp.float32(0.5)                                    # mode='scalar'
    vec_in_mask = jax.random.uniform(k3, (H,), dtype=jnp.float32)     # mode='vector_input'
    vec_out_mask = jax.random.uniform(k4, (V, 1), dtype=jnp.float32)  # mode='vector_output'

    input_ids = jax.random.randint(k5, (B, S), 0, V, dtype=jnp.int32)

    out = embeddings_with_masks(input_ids, w0, w1, w2,
                                scalar_mask, vec_in_mask, vec_out_mask)
    out = jax.block_until_ready(out)

    # Pure-JAX reference for correctness.
    merged_ref = scalar_mask * w0 + vec_in_mask[None, :] * w1 + vec_out_mask * w2
    ref = merged_ref[input_ids]
    assert out.shape == (B, S, H)
    assert jnp.allclose(out, ref, atol=1e-5, rtol=1e-5), "mismatch vs reference"

    print("KERNEL_OK")
</pallas_src>

<mosaic_0001>
module attributes {stable_mosaic.version = 11 : i64} {
  func.func @_merge_kernel(%arg0: i32, %arg1: memref<64x32xf32, #tpu.memory_space<vmem>>, %arg2: memref<64x32xf32, #tpu.memory_space<vmem>>, %arg3: memref<64x32xf32, #tpu.memory_space<vmem>>, %arg4: memref<1x32xf32, #tpu.memory_space<vmem>>, %arg5: memref<64x1xf32, #tpu.memory_space<vmem>>, %arg6: memref<1xf32, #tpu.memory_space<smem>>, %arg7: memref<64x32xf32, #tpu.memory_space<vmem>>) attributes {dimension_semantics = [#tpu.dimension_semantics<parallel>], iteration_bounds = array<i64: 1>, scalar_prefetch = 0 : i64, scratch_operands = 0 : i64, tpu.core_type = #tpu.core_type<tc>, window_params = [{transform_indices = @transform_0, window_bounds = array<i64: 64, 32>}, {transform_indices = @transform_1, window_bounds = array<i64: 64, 32>}, {transform_indices = @transform_2, window_bounds = array<i64: 64, 32>}, {pipeline_mode = #tpu.pipeline_mode<synchronous>, transform_indices = @transform_3, window_bounds = array<i64: 1, 32>}, {transform_indices = @transform_4, window_bounds = array<i64: 64, 1>}, {transform_indices = @transform_5, window_bounds = array<i64: 1>}, {transform_indices = @transform_6, window_bounds = array<i64: 64, 32>}]} {
    %c0 = arith.constant 0 : index
    %0 = memref.load %arg6[%c0] : memref<1xf32, #tpu.memory_space<smem>>
    %c0_0 = arith.constant 0 : index
    %c0_1 = arith.constant 0 : index
    %1 = vector.load %arg1[%c0_0, %c0_1] : memref<64x32xf32, #tpu.memory_space<vmem>>, vector<64x32xf32>
    %c0_2 = arith.constant 0 : index
    %c0_3 = arith.constant 0 : index
    %2 = vector.load %arg2[%c0_2, %c0_3] : memref<64x32xf32, #tpu.memory_space<vmem>>, vector<64x32xf32>
    %c0_4 = arith.constant 0 : index
    %c0_5 = arith.constant 0 : index
    %3 = vector.load %arg3[%c0_4, %c0_5] : memref<64x32xf32, #tpu.memory_space<vmem>>, vector<64x32xf32>
    %c0_6 = arith.constant 0 : index
    %c0_7 = arith.constant 0 : index
    %4 = vector.load %arg4[%c0_6, %c0_7] : memref<1x32xf32, #tpu.memory_space<vmem>>, vector<1x32xf32>
    %c0_8 = arith.constant 0 : index
    %c0_9 = arith.constant 0 : index
    %5 = vector.load %arg5[%c0_8, %c0_9] : memref<64x1xf32, #tpu.memory_space<vmem>>, vector<64x1xf32>
    %6 = vector.broadcast %0 : f32 to vector<64x32xf32>
    %7 = arith.mulf %1, %6 : vector<64x32xf32>
    %8 = vector.broadcast %4 : vector<1x32xf32> to vector<64x32xf32>
    %9 = arith.mulf %2, %8 : vector<64x32xf32>
    %10 = arith.addf %7, %9 : vector<64x32xf32>
    %11 = vector.broadcast %5 : vector<64x1xf32> to vector<64x32xf32>
    %12 = arith.mulf %3, %11 : vector<64x32xf32>
    %13 = arith.addf %10, %12 : vector<64x32xf32>
    %c0_10 = arith.constant 0 : index
    %c0_11 = arith.constant 0 : index
    %14 = vector.load %arg7[%c0_10, %c0_11] : memref<64x32xf32, #tpu.memory_space<vmem>>, vector<64x32xf32>
    tpu.vector_store %arg7[%c0_10, %c0_11], %13 {strides = array<i32>} : memref<64x32xf32, #tpu.memory_space<vmem>>, vector<64x32xf32>,
    return
  }
  func.func @transform_0(%arg0: i32) -> (i32, i32) {
    %c0_i32 = arith.constant 0 : i32
    %c0_i32_0 = arith.constant 0 : i32
    return %arg0, %c0_i32 : i32, i32
  }
  func.func @transform_1(%arg0: i32) -> (i32, i32) {
    %c0_i32 = arith.constant 0 : i32
    %c0_i32_0 = arith.constant 0 : i32
    return %arg0, %c0_i32 : i32, i32
  }
  func.func @transform_2(%arg0: i32) -> (i32, i32) {
    %c0_i32 = arith.constant 0 : i32
    %c0_i32_0 = arith.constant 0 : i32
    return %arg0, %c0_i32 : i32, i32
  }
  func.func @transform_3(%arg0: i32) -> (i32, i32) {
    %c0_i32 = arith.constant 0 : i32
    %c0_i32_0 = arith.constant 0 : i32
    %c0_i32_1 = arith.constant 0 : i32
    return %c0_i32, %c0_i32_0 : i32, i32
  }
  func.func @transform_4(%arg0: i32) -> (i32, i32) {
    %c0_i32 = arith.constant 0 : i32
    %c0_i32_0 = arith.constant 0 : i32
    return %arg0, %c0_i32 : i32, i32
  }
  func.func @transform_5(%arg0: i32) -> i32 {
    %c0_i32 = arith.constant 0 : i32
    %c0_i32_0 = arith.constant 0 : i32
    return %c0_i32 : i32
  }
  func.func @transform_6(%arg0: i32) -> (i32, i32) {
    %c0_i32 = arith.constant 0 : i32
    %c0_i32_0 = arith.constant 0 : i32
    return %arg0, %c0_i32 : i32, i32
  }
}

</mosaic_0001>

<bundles_post_ra>
// kernel: tpu_custom_call.1
= control target key start
LH: loop header
LB: loop body
LE: loop exit
PB: predicated region body
PF: predicated region fallthrough
CT: control target
= control target key end

     0   :  { %v160_v0 = vmov 0   ;;  %vm142_vm0 = vcmask 261120   ;;  %s350_s4 = inlined_call_operand.vmem [shape: f32[64,1], index: 4, kind: input, shape index: {}]   ;;  %s351_s3 = inlined_call_operand.vmem [shape: f32[1,32], index: 3, kind: input, shape index: {}]   ;;  %s352_s5 = inlined_call_operand.<no memory space> [shape: f32[1], index: 5, kind: input, shape index: {}]   ;;  %s353_s0 = inlined_call_operand.vmem [shape: f32[64,32], index: 0, kind: input, shape index: {}]   ;;  %s354_s1 = inlined_call_operand.vmem [shape: f32[64,32], index: 1, kind: input, shape index: {}]   ;;  %s355_s2 = inlined_call_operand.vmem [shape: f32[64,32], index: 2, kind: input, shape index: {}]   ;;  %s356_s6 = inlined_call_operand.vmem [shape: f32[64,32], index: 6, kind: output, shape index: {}]  }
   0x1   :  { %157 = vset.pattern.permute.xlu1 %v160_v0  ;;  %156 = vset.pattern.permute.xlu0 %v160_v0  ;;  %v52_v1 = vld [vmem:[%s350_s4 + $0x10] sm:$0xff]  ;;  %v50_v2 = vld [vmem:[%s350_s4] sm:$0xff]  ;;  %v53_v4 = vld [vmem:[%s350_s4 + $0x18] sm:$0xff]  ;;  %v234_v12 = vstv %s352_s5 }
   0x2   :  { %98 = vperm.xlu1 %157, %v52_v1   ;;  %88 = vperm.xlu0 %156, %v50_v2   ;;  %v54_v3 = vld [vmem:[%s350_s4 + $0x20] sm:$0xff]  ;;  %v51_v5 = vld [vmem:[%s350_s4 + $0x8] sm:$0xff]  ;;  %v57_v7 = vld [vmem:[%s350_s4 + $0x38] sm:$0xff] }
   0x3   :  { %158 = vset.pattern.permute.xlu2 %v160_v0  ;;  %v55_v6 = vld [vmem:[%s350_s4 + $0x28] sm:$0xff]  ;;  %v56_v8 = vld [vmem:[%s350_s4 + $0x30] sm:$0xff]  ;;  %v29_v9 = vld [vmem:[%s353_s0 + $0x20] sm:$0xff] }
   0x4   :  { %108 = vperm.xlu2 %158, %v54_v3   ;;  %v37_v10 = vld [vmem:[%s354_s1 + $0x20] sm:$0xff]  ;;  %v63_v13 = vmul.f32 %v234_v12, %v29_v9  ;;  %v30_v18 = vld [vmem:[%s353_s0 + $0x28] sm:$0xff]  ;;  %v27_v29 = vld [vmem:[%s353_s0 + $0x10] sm:$0xff] }
   0x5   :  { %v229_v11 = vld [vmem:[%s351_s3] ss:$0 sm:$0xff]  ;;  %v38_v19 = vld [vmem:[%s354_s1 + $0x28] sm:$0xff]  ;;  %v64_v22 = vmul.f32 %v234_v12, %v30_v18  ;;  %v35_v30 = vld [vmem:[%s354_s1 + $0x10] sm:$0xff]  ;;  %v61_v33 = vmul.f32 %v234_v12, %v27_v29 }
   0x6   :  { %v74_v14 = vmul.f32 %v229_v11, %v37_v10  ;;  %v45_v15 = vld [vmem:[%s355_s2 + $0x20] sm:$0xff]  ;;  %v75_v23 = vmul.f32 %v229_v11, %v38_v19  ;;  %v46_v24 = vld [vmem:[%s355_s2 + $0x28] sm:$0xff]  ;;  %v72_v34 = vmul.f32 %v229_v11, %v35_v30  ;;  %v43_v37 = vld [vmem:[%s355_s2 + $0x10] sm:$0xff] }
   0x7   :  { %v25_v31 = vld [vmem:[%s353_s0] sm:$0xff]  ;;  %v28_v41 = vld [vmem:[%s353_s0 + $0x18] sm:$0xff]  ;;  %v26_v45 = vld [vmem:[%s353_s0 + $0x8] sm:$0xff] }
   0x8   :  { %v82_v16 = vadd.f32 %v74_v14, %v63_v13  ;;  %v83_v25 = vadd.f32 %v75_v23, %v64_v22  ;;  %v33_v32 = vld [vmem:[%s354_s1] sm:$0xff]  ;;  %v59_v35 = vmul.f32 %v234_v12, %v25_v31  ;;  %v80_v39 = vadd.f32 %v72_v34, %v61_v33  ;;  %v36_v42 = vld [vmem:[%s354_s1 + $0x18] sm:$0xff]  ;;  %v34_v46 = vld [vmem:[%s354_s1 + $0x8] sm:$0xff] }
   0x9   :  { %v70_v36 = vmul.f32 %v229_v11, %v33_v32  ;;  %v41_v38 = vld [vmem:[%s355_s2] sm:$0xff]  ;;  %v62_v49 = vmul.f32 %v234_v12, %v28_v41  ;;  %v73_v50 = vmul.f32 %v229_v11, %v36_v42  ;;  %v60_v53 = vmul.f32 %v234_v12, %v26_v45  ;;  %v44_v55 = vld [vmem:[%s355_s2 + $0x18] sm:$0xff]  ;;  %v42_v56 = vld [vmem:[%s355_s2 + $0x8] sm:$0xff] }
   0xa   :  { %103 = vperm.xlu1 %157, %v53_v4   ;;  %93 = vperm.xlu0 %156, %v51_v5   ;;  %v71_v54 = vmul.f32 %v229_v11, %v34_v46  ;;  %v32_v59 = vld [vmem:[%s353_s0 + $0x38] sm:$0xff]  ;;  %v31_v63 = vld [vmem:[%s353_s0 + $0x30] sm:$0xff] }
   0xb   :  { %v78_v40 = vadd.f32 %v70_v36, %v59_v35  ;;  %v81_v57 = vadd.f32 %v73_v50, %v62_v49  ;;  %v40_v60 = vld [vmem:[%s354_s1 + $0x38] sm:$0xff]  ;;  %v39_v0 = vld [vmem:[%s354_s1 + $0x30] sm:$0xff]  ;;  %v66_v3 = vmul.f32 %v234_v12, %v32_v59 }
   0xc   :  { %113 = vperm.xlu2 %158, %v55_v6   ;;  %v79_v58 = vadd.f32 %v71_v54, %v60_v53  ;;  %v77_v4 = vmul.f32 %v229_v11, %v40_v60  ;;  %v48_v9 = vld [vmem:[%s355_s2 + $0x38] sm:$0xff]  ;;  %v47_v10 = vld [vmem:[%s355_s2 + $0x30] sm:$0xff] }
  0x12   :  { %123 = vperm.xlu1 %157, %v57_v7   ;;  %118 = vperm.xlu0 %156, %v56_v8   ;;  %v65_v7 = vmul.f32 %v234_v12, %v31_v63  ;;  %v76_v8 = vmul.f32 %v229_v11, %v39_v0  ;;  %v85_v12 = vadd.f32 %v77_v4, %v66_v3 }
  0x14   :  { %v84_v11 = vadd.f32 %v76_v8, %v65_v7 }
  0x5e   :  { %v109_v17 = vpop.permute.xlu2 %108 }
  0x5f   :  { %v130_v20 = vmul.f32 %v109_v17, %v45_v15 }
  0x61   :  { %v138_v21 = vadd.f32 %v130_v20, %v82_v16 }
  0x63   :  { %147 = vst.msk [vmem:[%s356_s6 + $0x20] sm:$0xff] %vm142_vm0, %v138_v21 }
  0x66   :  { %v114_v26 = vpop.permute.xlu2 %113 }
  0x67   :  { %v131_v27 = vmul.f32 %v114_v26, %v46_v24 }
  0x69   :  { %v139_v28 = vadd.f32 %v131_v27, %v83_v25 }
  0x6b   :  { %148 = vst.msk [vmem:[%s356_s6 + $0x28] sm:$0xff] %vm142_vm0, %v139_v28 }
  0x74   :  { %v99_v43 = vpop.permute.xlu1 %98  ;;  %v89_v44 = vpop.permute.xlu0 %88 }
  0x75   :  { %v128_v47 = vmul.f32 %v99_v43, %v43_v37  ;;  %v126_v48 = vmul.f32 %v89_v44, %v41_v38 }
  0x77   :  { %v136_v51 = vadd.f32 %v128_v47, %v80_v39  ;;  %v134_v52 = vadd.f32 %v126_v48, %v78_v40 }
  0x79   :  { %145 = vst.msk [vmem:[%s356_s6 + $0x10] sm:$0xff] %vm142_vm0, %v136_v51 }
  0x7a   :  { %143 = vst.msk [vmem:[%s356_s6] sm:$0xff] %vm142_vm0, %v134_v52 }
  0x7c   :  { %v104_v61 = vpop.permute.xlu1 %103  ;;  %v94_v62 = vpop.permute.xlu0 %93 }
  0x7d   :  { %v129_v1 = vmul.f32 %v104_v61, %v44_v55  ;;  %v127_v2 = vmul.f32 %v94_v62, %v42_v56 }
  0x7f   :  { %v137_v5 = vadd.f32 %v129_v1, %v81_v57  ;;  %v135_v6 = vadd.f32 %v127_v2, %v79_v58 }
  0x81   :  { %146 = vst.msk [vmem:[%s356_s6 + $0x18] sm:$0xff] %vm142_vm0, %v137_v5 }
  0x82   :  { %144 = vst.msk [vmem:[%s356_s6 + $0x8] sm:$0xff] %vm142_vm0, %v135_v6 }
  0x84   :  { %v124_v13 = vpop.permute.xlu1 %123  ;;  %v119_v14 = vpop.permute.xlu0 %118 }
  0x85   :  { %v133_v15 = vmul.f32 %v124_v13, %v48_v9  ;;  %v132_v16 = vmul.f32 %v119_v14, %v47_v10 }
  0x87   :  { %v141_v17 = vadd.f32 %v133_v15, %v85_v12  ;;  %v140_v18 = vadd.f32 %v132_v16, %v84_v11 }
  0x89   :  { %150 = vst.msk [vmem:[%s356_s6 + $0x38] sm:$0xff] %vm142_vm0, %v141_v17 }
  0x8a   :  { %149 = vst.msk [vmem:[%s356_s6 + $0x30] sm:$0xff] %vm142_vm0, %v140_v18 }

</bundles_post_ra>
